<compile_context>
chip_gen: v7x
topology: tpu7x:2x2x1
jax: 0.10.0
libtpu: 0.0.40
codegen_flags: <defaults>
</compile_context>

<pallas_src>
import functools

import jax
import jax.numpy as jnp
from jax.experimental import pallas as pl
from jax.experimental.pallas import tpu as pltpu

NEG_SLOPE = 0.2
BN_EPS = 1e-5


def _round_up(x, m):
    return (x + m - 1) // m * m


# ---------------------------------------------------------------------------
# Pass 1: conv-as-matmul + global BN statistics accumulation
# ---------------------------------------------------------------------------
def _conv_stats_kernel(p_ref, w_ref, gb_ref, y_ref, stats_ref, acc_ref, *, inv_m):
    """p_ref:(TM,K) bf16, w_ref:(K,CP) bf16, gb_ref:(2,CP) f32 [gamma;beta],
    y_ref:(TM,CP) f32 out, stats_ref:(2,CP) f32 out [scale;bias],
    acc_ref:(2,CP) f32 VMEM scratch [sum;sumsq] resident across the M grid."""
    i = pl.program_id(0)

    @pl.when(i == 0)
    def _init():
        acc_ref[...] = jnp.zeros_like(acc_ref)

    # MXU: bf16 x bf16 -> f32 accumulation.
    y = jnp.dot(p_ref[...], w_ref[...], preferred_element_type=jnp.float32)
    y_ref[...] = y

    # Rows beyond the true M are zero-padded patch rows -> contribute exactly 0,
    # so no masking is needed (the divisor below uses the true M, not M_pad).
    acc_ref[...] += jnp.concatenate(
        [jnp.sum(y, axis=0, keepdims=True),
         jnp.sum(y * y, axis=0, keepdims=True)], axis=0)

    @pl.when(i == pl.num_programs(0) - 1)
    def _finalize():
        acc = acc_ref[...]
        gb = gb_ref[...]
        mean = acc[0:1, :] * inv_m
        ex2 = acc[1:2, :] * inv_m
        var = ex2 - mean * mean                 # biased variance (as PyTorch BN uses)
        inv_std = jax.lax.rsqrt(var + BN_EPS)   # EUP slot (free-ish)
        scale = gb[0:1, :] * inv_std            # gamma / sqrt(var + eps)
        bias = gb[1:2, :] - mean * scale        # beta - mean * scale
        stats_ref[...] = jnp.concatenate([scale, bias], axis=0)


# ---------------------------------------------------------------------------
# Pass 2: z = y * scale + bias, LeakyReLU(0.2)
# ---------------------------------------------------------------------------
def _bn_lrelu_kernel(stats_ref, y_ref, out_ref):
    stats = stats_ref[...]
    z = y_ref[...] * stats[0:1, :] + stats[1:2, :]
    out_ref[...] = jnp.where(z >= 0, z, NEG_SLOPE * z)


def _choose_tile_m(M, K, CP):
    # Per-row pass-1 VMEM bytes: bf16 patch row + f32 y row, double-buffered.
    per_row = K * 2 + CP * 4
    budget = 24 * 1024 * 1024          # conservative: leaves headroom on v7x's 64 MiB VMEM
    t = budget // (2 * per_row)
    t = max(8, min(int(t), 1024))      # 512-1024 rows ~ HBM-roofline sweet spot
    t = _round_up(min(t, M), 8)
    return int(t)


def conv_block_forward(x, weight, gamma, beta, *, stride, padding):
    """x: (N, Cin, H, W) f32; weight: (Cout, Cin, KH, KW) f32; gamma/beta: (Cout,) f32."""
    N, C, H, W = x.shape
    Cout, Cin, KH, KW = weight.shape
    assert C == Cin
    OH = (H + 2 * padding - KH) // stride + 1
    OW = (W + 2 * padding - KW) // stride + 1

    M = N * OH * OW
    K = Cin * KH * KW
    CP = _round_up(Cout, 128)          # lane-dense weight / output columns
    TILE_M = _choose_tile_m(M, K, CP)
    M_pad = _round_up(M, TILE_M)
    num_tiles = M_pad // TILE_M

    # --- glue: im2col emitted directly in bf16 (halves HBM traffic of the patch matrix).
    # TODO(synk): fuse im2col into the kernel (strided DMA from an NHWC HBM ref into a
    # VMEM patch tile) to remove this wrapper-side materialization entirely.
    xb = x.astype(jnp.bfloat16)
    xp = jnp.pad(xb, ((0, 0), (0, 0), (padding, padding), (padding, padding)))
    cols = []
    for kh in range(KH):
        for kw in range(KW):
            cols.append(xp[:, :, kh:kh + stride * OH:stride, kw:kw + stride * OW:stride])
    patches = jnp.stack(cols, axis=0).reshape(KH, KW, N, C, OH, OW)
    patches = patches.transpose(2, 4, 5, 3, 0, 1).reshape(M, K)
    if M_pad != M:
        patches = jnp.pad(patches, ((0, M_pad - M), (0, 0)))

    # weights flattened in matching (Cin, KH, KW) order, zero-padded to CP lanes
    wmat = jnp.zeros((K, CP), jnp.bfloat16)
    wmat = wmat.at[:, :Cout].set(weight.astype(jnp.bfloat16).reshape(Cout, K).T)

    # gamma / beta packed into one tiny resident f32 block (constant index_map)
    gb = jnp.zeros((2, CP), jnp.float32)
    gb = gb.at[0, :Cout].set(gamma).at[1, :Cout].set(beta)

    vmem_limit = 32 * 1024 * 1024

    # ---- pass 1: matmul + BN-stat accumulation (grid over M, sequential) ----
    y_flat, stats = pl.pallas_call(
        functools.partial(_conv_stats_kernel, inv_m=1.0 / float(M)),
        grid=(num_tiles,),
        in_specs=[
            pl.BlockSpec((TILE_M, K), lambda i: (i, 0)),
            pl.BlockSpec((K, CP), lambda i: (0, 0)),
            pl.BlockSpec((2, CP), lambda i: (0, 0)),
        ],
        out_specs=[
            pl.BlockSpec((TILE_M, CP), lambda i: (i, 0)),
            pl.BlockSpec((2, CP), lambda i: (0, 0)),
        ],
        out_shape=(
            jax.ShapeDtypeStruct((M_pad, CP), jnp.float32),
            jax.ShapeDtypeStruct((2, CP), jnp.float32),
        ),
        scratch_shapes=[pltpu.VMEM((2, CP), jnp.float32)],
        compiler_params=pltpu.CompilerParams(
            # stats output + scratch accumulate across the M axis -> must be "arbitrary"
            dimension_semantics=("arbitrary",),
            vmem_limit_bytes=vmem_limit),
        cost_estimate=pl.CostEstimate(
            flops=2 * M_pad * K * CP,
            transcendentals=0,
            bytes_accessed=M_pad * K * 2 + K * CP * 2 + M_pad * CP * 4 + 4 * CP * 4),
    )(patches, wmat, gb)

    # ---- pass 2: normalize + LeakyReLU (independent tiles, aliases y's buffer) ----
    out_flat = pl.pallas_call(
        _bn_lrelu_kernel,
        grid=(num_tiles,),
        in_specs=[
            pl.BlockSpec((2, CP), lambda i: (0, 0)),
            pl.BlockSpec((TILE_M, CP), lambda i: (i, 0)),
        ],
        out_specs=pl.BlockSpec((TILE_M, CP), lambda i: (i, 0)),
        out_shape=jax.ShapeDtypeStruct((M_pad, CP), jnp.float32),
        input_output_aliases={1: 0},   # reuse y's HBM buffer for the output (P8)
        compiler_params=pltpu.CompilerParams(
            dimension_semantics=("parallel",),
            vmem_limit_bytes=vmem_limit),
        cost_estimate=pl.CostEstimate(
            flops=4 * M_pad * CP,
            transcendentals=0,
            bytes_accessed=2 * M_pad * CP * 4 + 2 * CP * 4),
    )(stats, y_flat)

    # back to NCHW, dropping M / channel padding
    return out_flat[:M, :Cout].reshape(N, OH, OW, Cout).transpose(0, 3, 1, 2)


def reference_forward(x, weight, gamma, beta, *, stride, padding):
    y = jax.lax.conv_general_dilated(
        x, weight, (stride, stride), ((padding, padding), (padding, padding)),
        dimension_numbers=("NCHW", "OIHW", "NCHW"),
        precision=jax.lax.Precision.HIGHEST)
    mean = y.mean(axis=(0, 2, 3), keepdims=True)
    var = ((y - mean) ** 2).mean(axis=(0, 2, 3), keepdims=True)  # biased, like PyTorch BN
    z = (y - mean) * jax.lax.rsqrt(var + BN_EPS) * gamma.reshape(1, -1, 1, 1) \
        + beta.reshape(1, -1, 1, 1)
    return jnp.where(z >= 0, z, NEG_SLOPE * z)


if __name__ == "__main__":
    # Conv_block(in_ch=4, out_ch=8, kernel_size=4, stride=2, padding=1, bias=False, norm=True)
    in_ch, out_ch, ksize, stride, padding = 4, 8, 4, 2, 1
    N, H, W = 2, 16, 16

    key = jax.random.PRNGKey(0)
    kx, kw, kg, kb = jax.random.split(key, 4)
    x = jax.random.normal(kx, (N, in_ch, H, W), dtype=jnp.float32)
    weight = jax.random.normal(kw, (out_ch, in_ch, ksize, ksize), dtype=jnp.float32) * 0.05
    gamma = 1.0 + 0.1 * jax.random.normal(kg, (out_ch,), dtype=jnp.float32)
    beta = 0.1 * jax.random.normal(kb, (out_ch,), dtype=jnp.float32)
    # TODO(synk): BatchNorm running_mean/running_var momentum updates (training bookkeeping)
    # are not modeled; only the forward normalization with batch statistics is computed.

    fwd = jax.jit(functools.partial(conv_block_forward, stride=stride, padding=padding))
    out = jax.block_until_ready(fwd(x, weight, gamma, beta))
    assert out.shape == (N, out_ch, H // 2, W // 2), out.shape

    # Tight check: reference fed the same bf16-rounded conv operands (verifies the
    # kernel's im2col / BN / LeakyReLU structure exactly, f32 accumulation both sides).
    xq = x.astype(jnp.bfloat16).astype(jnp.float32)
    wq = weight.astype(jnp.bfloat16).astype(jnp.float32)
    ref_q = reference_forward(xq, wq, gamma, beta, stride=stride, padding=padding)
    err_q = float(jnp.abs(out - ref_q).max())
    assert jnp.allclose(out, ref_q, atol=1e-3, rtol=1e-3), err_q

    # Loose check vs full-f32 module semantics (bounds the intentional bf16 MXU quantization).
    ref = reference_forward(x, weight, gamma, beta, stride=stride, padding=padding)
    err = float(jnp.abs(out - ref).max())
    assert jnp.allclose(out, ref, atol=5e-2, rtol=5e-2), err

    print("KERNEL_OK")
</pallas_src>

<mosaic_0001>
module attributes {stable_mosaic.version = 11 : i64} {
  func.func @_bn_lrelu_kernel(%arg0: i32, %arg1: memref<2x128xf32, #tpu.memory_space<vmem>>, %arg2: memref<128x128xf32, #tpu.memory_space<vmem>>, %arg3: memref<128x128xf32, #tpu.memory_space<vmem>>) attributes {dimension_semantics = [#tpu.dimension_semantics<parallel>], iteration_bounds = array<i64: 1>, scalar_prefetch = 0 : i64, scratch_operands = 0 : i64, tpu.core_type = #tpu.core_type<tc>, window_params = [{pipeline_mode = #tpu.pipeline_mode<synchronous>, transform_indices = @transform_0, window_bounds = array<i64: 2, 128>}, {transform_indices = @transform_1, window_bounds = array<i64: 128, 128>}, {transform_indices = @transform_2, window_bounds = array<i64: 128, 128>}]} {
    %c0 = arith.constant 0 : index
    %c0_0 = arith.constant 0 : index
    %0 = vector.load %arg1[%c0, %c0_0] : memref<2x128xf32, #tpu.memory_space<vmem>>, vector<2x128xf32>
    %c0_1 = arith.constant 0 : index
    %c0_2 = arith.constant 0 : index
    %1 = vector.load %arg2[%c0_1, %c0_2] : memref<128x128xf32, #tpu.memory_space<vmem>>, vector<128x128xf32>
    %2 = vector.extract_strided_slice %0 {offsets = [0, 0], sizes = [1, 128], strides = [1, 1]} : vector<2x128xf32> to vector<1x128xf32>
    %3 = vector.broadcast %2 : vector<1x128xf32> to vector<128x128xf32>
    %4 = arith.mulf %1, %3 : vector<128x128xf32>
    %5 = vector.extract_strided_slice %0 {offsets = [1, 0], sizes = [1, 128], strides = [1, 1]} : vector<2x128xf32> to vector<1x128xf32>
    %6 = vector.broadcast %5 : vector<1x128xf32> to vector<128x128xf32>
    %7 = arith.addf %4, %6 : vector<128x128xf32>
    %cst = arith.constant 0.000000e+00 : f32
    %8 = vector.broadcast %cst : f32 to vector<128x128xf32>
    %9 = arith.cmpf oge, %7, %8 : vector<128x128xf32>
    %cst_3 = arith.constant 2.000000e-01 : f32
    %10 = vector.broadcast %cst_3 : f32 to vector<128x128xf32>
    %11 = arith.mulf %10, %7 : vector<128x128xf32>
    %12 = arith.select %9, %7, %11 : vector<128x128xi1>, vector<128x128xf32>
    %c0_4 = arith.constant 0 : index
    %c0_5 = arith.constant 0 : index
    %13 = vector.load %arg3[%c0_4, %c0_5] : memref<128x128xf32, #tpu.memory_space<vmem>>, vector<128x128xf32>
    tpu.vector_store %arg3[%c0_4, %c0_5], %12 {strides = array<i32>} : memref<128x128xf32, #tpu.memory_space<vmem>>, vector<128x128xf32>,
    return
  }
  func.func @transform_0(%arg0: i32) -> (i32, i32) {
    %c0_i32 = arith.constant 0 : i32
    %c0_i32_0 = arith.constant 0 : i32
    %c0_i32_1 = arith.constant 0 : i32
    return %c0_i32, %c0_i32_0 : i32, i32
  }
  func.func @transform_1(%arg0: i32) -> (i32, i32) {
    %c0_i32 = arith.constant 0 : i32
    %c0_i32_0 = arith.constant 0 : i32
    return %arg0, %c0_i32 : i32, i32
  }
  func.func @transform_2(%arg0: i32) -> (i32, i32) {
    %c0_i32 = arith.constant 0 : i32
    %c0_i32_0 = arith.constant 0 : i32
    return %arg0, %c0_i32 : i32, i32
  }
}

module attributes {stable_mosaic.version = 11 : i64} {
  func.func @_conv_stats_kernel(%arg0: i32, %arg1: memref<128x64xbf16, #tpu.memory_space<vmem>>, %arg2: memref<64x128xbf16, #tpu.memory_space<vmem>>, %arg3: memref<2x128xf32, #tpu.memory_space<vmem>>, %arg4: memref<128x128xf32, #tpu.memory_space<vmem>>, %arg5: memref<2x128xf32, #tpu.memory_space<vmem>>, %arg6: memref<2x128xf32, #tpu.memory_space<vmem>>) attributes {dimension_semantics = [#tpu.dimension_semantics<arbitrary>], iteration_bounds = array<i64: 1>, scalar_prefetch = 0 : i64, scratch_operands = 1 : i64, tpu.core_type = #tpu.core_type<tc>, window_params = [{transform_indices = @transform_0, window_bounds = array<i64: 128, 64>}, {pipeline_mode = #tpu.pipeline_mode<synchronous>, transform_indices = @transform_1, window_bounds = array<i64: 64, 128>}, {pipeline_mode = #tpu.pipeline_mode<synchronous>, transform_indices = @transform_2, window_bounds = array<i64: 2, 128>}, {transform_indices = @transform_3, window_bounds = array<i64: 128, 128>}, {pipeline_mode = #tpu.pipeline_mode<synchronous>, transform_indices = @transform_4, window_bounds = array<i64: 2, 128>}]} {
    %c0_i32 = arith.constant 0 : i32
    %0 = arith.cmpi eq, %arg0, %c0_i32 : i32
    %1 = arith.extui %0 : i1 to i32
    %c0_i32_0 = arith.constant 0 : i32
    %2 = arith.cmpi ne, %1, %c0_i32_0 : i32
    scf.if %2 {
      %cst_14 = arith.constant 0.000000e+00 : f32
      %19 = vector.broadcast %cst_14 : f32 to vector<2x128xf32>
      %c0_15 = arith.constant 0 : index
      %c0_16 = arith.constant 0 : index
      %20 = vector.load %arg6[%c0_15, %c0_16] : memref<2x128xf32, #tpu.memory_space<vmem>>, vector<2x128xf32>
      tpu.vector_store %arg6[%c0_15, %c0_16], %19 {strides = array<i32>} : memref<2x128xf32, #tpu.memory_space<vmem>>, vector<2x128xf32>,
    } else {
    }
    %c0 = arith.constant 0 : index
    %c0_1 = arith.constant 0 : index
    %3 = vector.load %arg1[%c0, %c0_1] : memref<128x64xbf16, #tpu.memory_space<vmem>>, vector<128x64xbf16>
    %c0_2 = arith.constant 0 : index
    %c0_3 = arith.constant 0 : index
    %4 = vector.load %arg2[%c0_2, %c0_3] : memref<64x128xbf16, #tpu.memory_space<vmem>>, vector<64x128xbf16>
    %cst = arith.constant dense<0.000000e+00> : vector<128x128xf32>
    %5 = tpu.matmul %3, %4, %cst {dimension_numbers = #tpu.dot_dimension_numbers<[1], [0], [0], [1], [0, 0, 1, 1], [], []>} : vector<128x64xbf16>, vector<64x128xbf16>, vector<128x128xf32> -> vector<128x128xf32>
    %c0_4 = arith.constant 0 : index
    %c0_5 = arith.constant 0 : index
    %6 = vector.load %arg4[%c0_4, %c0_5] : memref<128x128xf32, #tpu.memory_space<vmem>>, vector<128x128xf32>
    tpu.vector_store %arg4[%c0_4, %c0_5], %5 {strides = array<i32>} : memref<128x128xf32, #tpu.memory_space<vmem>>, vector<128x128xf32>,
    %c0_6 = arith.constant 0 : index
    %c0_7 = arith.constant 0 : index
    %7 = vector.load %arg6[%c0_6, %c0_7] : memref<2x128xf32, #tpu.memory_space<vmem>>, vector<2x128xf32>
    %cst_8 = arith.constant dense<0.000000e+00> : vector<128xf32>
    %8 = vector.multi_reduction <add>, %5, %cst_8 [0] : vector<128x128xf32> to vector<128xf32>
    %9 = vector.shape_cast %8 : vector<128xf32> to vector<1x128xf32>
    %10 = arith.mulf %5, %5 : vector<128x128xf32>
    %cst_9 = arith.constant dense<0.000000e+00> : vector<128xf32>
    %11 = vector.multi_reduction <add>, %10, %cst_9 [0] : vector<128x128xf32> to vector<128xf32>
    %12 = vector.shape_cast %11 : vector<128xf32> to vector<1x128xf32>
    %13 = tpu.concatenate %9, %12 in 0 : vector<1x128xf32>, vector<1x128xf32> -> vector<2x128xf32>
    %14 = arith.addf %7, %13 : vector<2x128xf32>
    %c0_10 = arith.constant 0 : index
    %c0_11 = arith.constant 0 : index
    %15 = vector.load %arg6[%c0_10, %c0_11] : memref<2x128xf32, #tpu.memory_space<vmem>>, vector<2x128xf32>
    tpu.vector_store %arg6[%c0_10, %c0_11], %14 {strides = array<i32>} : memref<2x128xf32, #tpu.memory_space<vmem>>, vector<2x128xf32>,
    %c0_i32_12 = arith.constant 0 : i32
    %16 = arith.cmpi eq, %arg0, %c0_i32_12 : i32
    %17 = arith.extui %16 : i1 to i32
    %c0_i32_13 = arith.constant 0 : i32
    %18 = arith.cmpi ne, %17, %c0_i32_13 : i32
    scf.if %18 {
      %c0_14 = arith.constant 0 : index
      %c0_15 = arith.constant 0 : index
      %19 = vector.load %arg6[%c0_14, %c0_15] : memref<2x128xf32, #tpu.memory_space<vmem>>, vector<2x128xf32>
      %c0_16 = arith.constant 0 : index
      %c0_17 = arith.constant 0 : index
      %20 = vector.load %arg3[%c0_16, %c0_17] : memref<2x128xf32, #tpu.memory_space<vmem>>, vector<2x128xf32>
      %21 = vector.extract_strided_slice %19 {offsets = [0, 0], sizes = [1, 128], strides = [1, 1]} : vector<2x128xf32> to vector<1x128xf32>
      %cst_18 = arith.constant 7.812500e-03 : f32
      %22 = vector.broadcast %cst_18 : f32 to vector<1x128xf32>
      %23 = arith.mulf %21, %22 : vector<1x128xf32>
      %24 = vector.extract_strided_slice %19 {offsets = [1, 0], sizes = [1, 128], strides = [1, 1]} : vector<2x128xf32> to vector<1x128xf32>
      %cst_19 = arith.constant 7.812500e-03 : f32
      %25 = vector.broadcast %cst_19 : f32 to vector<1x128xf32>
      %26 = arith.mulf %24, %25 : vector<1x128xf32>
      %27 = arith.mulf %23, %23 : vector<1x128xf32>
      %28 = arith.subf %26, %27 : vector<1x128xf32>
      %cst_20 = arith.constant 9.99999974E-6 : f32
      %29 = vector.broadcast %cst_20 : f32 to vector<1x128xf32>
      %30 = arith.addf %28, %29 : vector<1x128xf32>
      %31 = math.rsqrt %30 : vector<1x128xf32>
      %32 = vector.extract_strided_slice %20 {offsets = [0, 0], sizes = [1, 128], strides = [1, 1]} : vector<2x128xf32> to vector<1x128xf32>
      %33 = arith.mulf %32, %31 : vector<1x128xf32>
      %34 = vector.extract_strided_slice %20 {offsets = [1, 0], sizes = [1, 128], strides = [1, 1]} : vector<2x128xf32> to vector<1x128xf32>
      %35 = arith.mulf %23, %33 : vector<1x128xf32>
      %36 = arith.subf %34, %35 : vector<1x128xf32>
      %37 = tpu.concatenate %33, %36 in 0 : vector<1x128xf32>, vector<1x128xf32> -> vector<2x128xf32>
      %c0_21 = arith.constant 0 : index
      %c0_22 = arith.constant 0 : index
      %38 = vector.load %arg5[%c0_21, %c0_22] : memref<2x128xf32, #tpu.memory_space<vmem>>, vector<2x128xf32>
      tpu.vector_store %arg5[%c0_21, %c0_22], %37 {strides = array<i32>} : memref<2x128xf32, #tpu.memory_space<vmem>>, vector<2x128xf32>,
    } else {
    }
    return
  }
  func.func @transform_0(%arg0: i32) -> (i32, i32) {
    %c0_i32 = arith.constant 0 : i32
    %c0_i32_0 = arith.constant 0 : i32
    return %arg0, %c0_i32 : i32, i32
  }
  func.func @transform_1(%arg0: i32) -> (i32, i32) {
    %c0_i32 = arith.constant 0 : i32
    %c0_i32_0 = arith.constant 0 : i32
    %c0_i32_1 = arith.constant 0 : i32
    return %c0_i32, %c0_i32_0 : i32, i32
  }
  func.func @transform_2(%arg0: i32) -> (i32, i32) {
    %c0_i32 = arith.constant 0 : i32
    %c0_i32_0 = arith.constant 0 : i32
    %c0_i32_1 = arith.constant 0 : i32
    return %c0_i32, %c0_i32_0 : i32, i32
  }
  func.func @transform_3(%arg0: i32) -> (i32, i32) {
    %c0_i32 = arith.constant 0 : i32
    %c0_i32_0 = arith.constant 0 : i32
    return %arg0, %c0_i32 : i32, i32
  }
  func.func @transform_4(%arg0: i32) -> (i32, i32) {
    %c0_i32 = arith.constant 0 : i32
    %c0_i32_0 = arith.constant 0 : i32
    %c0_i32_1 = arith.constant 0 : i32
    return %c0_i32, %c0_i32_0 : i32, i32
  }
}

</mosaic_0001>

<bundles_post_ra>
// kernel: conv_block_forward.3
= control target key start
LH: loop header
LB: loop body
LE: loop exit
PB: predicated region body
PF: predicated region fallthrough
CT: control target
= control target key end

     0   :  { %v28_v0 = vlaneseq  ;;  %s286_s0 = inlined_call_operand.vmem [shape: f32[2,128], index: 0, kind: input, shape index: {}]   ;;  %s287_s1 = inlined_call_operand.vmem [shape: f32[128,128], index: 1, kind: input, shape index: {}, may-alias: {1,2}]   ;;  %s288_s2 = inlined_call_operand.vmem [shape: f32[128,128], index: 2, kind: output, shape index: {}, may-alias: {1,2}]  }
   0x1   :  { %v11_v2 = vld [vmem:[%s286_s0] sm:$0x3]  ;;  %v13_v6 = vld [vmem:[%s287_s1 + $0x8] sm:$0xff]  ;;  %v14_v7 = vld [vmem:[%s287_s1 + $0x10] sm:$0xff] }
   0x2   :  { %v29_v1 = vshrl.u32 %v28_v0, 7  ;;  %v12_v3 = vld [vmem:[%s287_s1] sm:$0xff]  ;;  %v15_v8 = vld [vmem:[%s287_s1 + $0x18] sm:$0xff]  ;;  %v17_v12 = vld [vmem:[%s287_s1 + $0x28] sm:$0xff] }
   0x3   :  { %v16_v9 = vld [vmem:[%s287_s1 + $0x20] sm:$0xff]  ;;  %v18_v13 = vld [vmem:[%s287_s1 + $0x30] sm:$0xff]  ;;  %v19_v14 = vld [vmem:[%s287_s1 + $0x38] sm:$0xff] }
   0x4   :  { %v30_v4 = vsub.s32 0, %v29_v1  ;;  %v50_v5 = vsub.s32 1, %v29_v1  ;;  %v20_v38 = vld [vmem:[%s287_s1 + $0x40] sm:$0xff]  ;;  %v21_v39 = vld [vmem:[%s287_s1 + $0x48] sm:$0xff] }
   0x6   :  { %v169_v10 = vrot.slane %v11_v2, %v30_v4  ;;  %v171_v11 = vrot.slane %v11_v2, %v50_v5 }
   0x8   :  { %v32_v15 = vmul.f32 %v169_v10, %v12_v3  ;;  %v33_v16 = vmul.f32 %v169_v10, %v13_v6  ;;  %v34_v17 = vmul.f32 %v169_v10, %v14_v7  ;;  %v35_v18 = vmul.f32 %v169_v10, %v15_v8 }
   0x9   :  { %v36_v19 = vmul.f32 %v169_v10, %v16_v9  ;;  %v37_v20 = vmul.f32 %v169_v10, %v17_v12  ;;  %v38_v21 = vmul.f32 %v169_v10, %v18_v13  ;;  %v39_v22 = vmul.f32 %v169_v10, %v19_v14 }
   0xa   :  { %v52_v23 = vadd.f32 %v171_v11, %v32_v15  ;;  %v53_v24 = vadd.f32 %v171_v11, %v33_v16  ;;  %v54_v25 = vadd.f32 %v171_v11, %v34_v17  ;;  %v55_v26 = vadd.f32 %v171_v11, %v35_v18 }
   0xb   :  { %v56_v27 = vadd.f32 %v171_v11, %v36_v19  ;;  %v57_v28 = vadd.f32 %v171_v11, %v37_v20  ;;  %v58_v29 = vadd.f32 %v171_v11, %v38_v21  ;;  %v59_v30 = vadd.f32 %v171_v11, %v39_v22 }
   0xc   :  { %vm68_vm0 = vcmp.ge.f32.partialorder %v52_v23, 0.0  ;;  %v84_v31 = vmul.f32 0.2, %v52_v23  ;;  %vm69_vm1 = vcmp.ge.f32.partialorder %v53_v24, 0.0  ;;  %v85_v32 = vmul.f32 0.2, %v53_v24 }
   0xd   :  { %vm70_vm2 = vcmp.ge.f32.partialorder %v54_v25, 0.0  ;;  %v86_v33 = vmul.f32 0.2, %v54_v25  ;;  %vm71_vm3 = vcmp.ge.f32.partialorder %v55_v26, 0.0  ;;  %v87_v34 = vmul.f32 0.2, %v55_v26 }
   0xe   :  { %v100_v35 = vsel %vm68_vm0, %v52_v23, %v84_v31  ;;  %v101_v36 = vsel %vm69_vm1, %v53_v24, %v85_v32  ;;  %vm72_vm4 = vcmp.ge.f32.partialorder %v56_v27, 0.0  ;;  %v88_v37 = vmul.f32 0.2, %v56_v27 }
   0xf   :  { %116 = vst [vmem:[%s288_s2] sm:$0xff] %v100_v35  ;;  %117 = vst [vmem:[%s288_s2 + $0x8] sm:$0xff] %v101_v36  ;;  %v102_v40 = vsel %vm70_vm2, %v54_v25, %v86_v33  ;;  %v103_v41 = vsel %vm71_vm3, %v55_v26, %v87_v34  ;;  %vm73_vm5 = vcmp.ge.f32.partialorder %v57_v28, 0.0  ;;  %v89_v42 = vmul.f32 0.2, %v57_v28 }
  0x10   :  { %v104_v46 = vsel %vm72_vm4, %v56_v27, %v88_v37  ;;  %vm74_vm6 = vcmp.ge.f32.partialorder %v58_v29, 0.0  ;;  %v90_v47 = vmul.f32 0.2, %v58_v29  ;;  %vm75_vm7 = vcmp.ge.f32.partialorder %v59_v30, 0.0 }
  0x11   :  { %v105_v49 = vsel %vm73_vm5, %v57_v28, %v89_v42  ;;  %v91_v50 = vmul.f32 0.2, %v59_v30  ;;  %v40_v51 = vmul.f32 %v169_v10, %v20_v38  ;;  %v41_v52 = vmul.f32 %v169_v10, %v21_v39 }
  0x12   :  { %v106_v54 = vsel %vm74_vm6, %v58_v29, %v90_v47 }
  0x13   :  { %v107_v58 = vsel %vm75_vm7, %v59_v30, %v91_v50  ;;  %v60_v59 = vadd.f32 %v171_v11, %v40_v51  ;;  %v61_v60 = vadd.f32 %v171_v11, %v41_v52 }
  0x15   :  { %vm76_vm8 = vcmp.ge.f32.partialorder %v60_v59, 0.0  ;;  %v92_v3 = vmul.f32 0.2, %v60_v59  ;;  %vm77_vm9 = vcmp.ge.f32.partialorder %v61_v60, 0.0  ;;  %v93_v4 = vmul.f32 0.2, %v61_v60 }
  0x16   :  { %v22_v43 = vld [vmem:[%s287_s1 + $0x50] sm:$0xff]  ;;  %v23_v44 = vld [vmem:[%s287_s1 + $0x58] sm:$0xff]  ;;  %v24_v45 = vld [vmem:[%s287_s1 + $0x60] sm:$0xff] }
  0x17   :  { %118 = vst [vmem:[%s288_s2 + $0x10] sm:$0xff] %v102_v40  ;;  %119 = vst [vmem:[%s288_s2 + $0x18] sm:$0xff] %v103_v41  ;;  %v42_v55 = vmul.f32 %v169_v10, %v22_v43  ;;  %v43_v56 = vmul.f32 %v169_v10, %v23_v44  ;;  %v44_v57 = vmul.f32 %v169_v10, %v24_v45 }
  0x18   :  { %v108_v7 = vsel %vm76_vm8, %v60_v59, %v92_v3  ;;  %v109_v8 = vsel %vm77_vm9, %v61_v60, %v93_v4 }
  0x19   :  { %v62_v62 = vadd.f32 %v171_v11, %v42_v55  ;;  %v63_v63 = vadd.f32 %v171_v11, %v43_v56  ;;  %v64_v0 = vadd.f32 %v171_v11, %v44_v57 }
  0x1b   :  { %vm78_vm10 = vcmp.ge.f32.partialorder %v62_v62, 0.0  ;;  %v94_v5 = vmul.f32 0.2, %v62_v62  ;;  %vm79_vm11 = vcmp.ge.f32.partialorder %v63_v63, 0.0  ;;  %v95_v6 = vmul.f32 0.2, %v63_v63 }
  0x1c   :  { %vm80_vm12 = vcmp.ge.f32.partialorder %v64_v0, 0.0  ;;  %v96_v9 = vmul.f32 0.2, %v64_v0 }
  0x1d   :  { %v110_v12 = vsel %vm78_vm10, %v62_v62, %v94_v5  ;;  %v111_v13 = vsel %vm79_vm11, %v63_v63, %v95_v6 }
  0x1e   :  { %v25_v48 = vld [vmem:[%s287_s1 + $0x68] sm:$0xff]  ;;  %v112_v16 = vsel %vm80_vm12, %v64_v0, %v96_v9 }
  0x1f   :  { %120 = vst [vmem:[%s288_s2 + $0x20] sm:$0xff] %v104_v46  ;;  %v45_v61 = vmul.f32 %v169_v10, %v25_v48 }
  0x21   :  { %v65_v14 = vadd.f32 %v171_v11, %v45_v61 }
  0x23   :  { %vm81_vm13 = vcmp.ge.f32.partialorder %v65_v14, 0.0  ;;  %v97_v18 = vmul.f32 0.2, %v65_v14 }
  0x25   :  { %v113_v21 = vsel %vm81_vm13, %v65_v14, %v97_v18 }
  0x26   :  { %v26_v53 = vld [vmem:[%s287_s1 + $0x70] sm:$0xff] }
  0x27   :  { %121 = vst [vmem:[%s288_s2 + $0x28] sm:$0xff] %v105_v49  ;;  %122 = vst [vmem:[%s288_s2 + $0x30] sm:$0xff] %v106_v54  ;;  %v46_v1 = vmul.f32 %v169_v10, %v26_v53 }
  0x28   :  { %123 = vst [vmem:[%s288_s2 + $0x38] sm:$0xff] %v107_v58 }
  0x29   :  { %v66_v15 = vadd.f32 %v171_v11, %v46_v1 }
  0x2b   :  { %vm82_vm14 = vcmp.ge.f32.partialorder %v66_v15, 0.0  ;;  %v98_v19 = vmul.f32 0.2, %v66_v15 }
  0x2d   :  { %v114_v22 = vsel %vm82_vm14, %v66_v15, %v98_v19 }
  0x2f   :  { %v27_v2 = vld [vmem:[%s287_s1 + $0x78] sm:$0xff] }
  0x30   :  { %124 = vst [vmem:[%s288_s2 + $0x40] sm:$0xff] %v108_v7  ;;  %125 = vst [vmem:[%s288_s2 + $0x48] sm:$0xff] %v109_v8  ;;  %v47_v17 = vmul.f32 %v169_v10, %v27_v2 }
  0x31   :  { %126 = vst [vmem:[%s288_s2 + $0x50] sm:$0xff] %v110_v12  ;;  %127 = vst [vmem:[%s288_s2 + $0x58] sm:$0xff] %v111_v13 }
  0x32   :  { %128 = vst [vmem:[%s288_s2 + $0x60] sm:$0xff] %v112_v16  ;;  %v67_v20 = vadd.f32 %v171_v11, %v47_v17  ;;  %129 = vst [vmem:[%s288_s2 + $0x68] sm:$0xff] %v113_v21 }
  0x33   :  { %130 = vst [vmem:[%s288_s2 + $0x70] sm:$0xff] %v114_v22 }
  0x34   :  { %vm83_vm15 = vcmp.ge.f32.partialorder %v67_v20, 0.0  ;;  %v99_v10 = vmul.f32 0.2, %v67_v20 }
  0x36   :  { %v115_v23 = vsel %vm83_vm15, %v67_v20, %v99_v10 }
  0x37   :  { %131 = vst [vmem:[%s288_s2 + $0x78] sm:$0xff] %v115_v23 }

// kernel: conv_block_forward.2
= control target key start
LH: loop header
LB: loop body
LE: loop exit
PB: predicated region body
PF: predicated region fallthrough
CT: control target
= control target key end

     0   :  { %vm110_vm0 = vcmask 523264   ;;  %v422_v12 = vmov 0.0   ;;  %vm307_vm1 = vcmask 1040384   ;;  %s548_s1 = inlined_call_operand.vmem [shape: bf16[64,128], index: 1, kind: input, shape index: {}]   ;;  %s549_s0 = inlined_call_operand.vmem [shape: bf16[128,64], index: 0, kind: input, shape index: {}]   ;;  %s550_s3 = inlined_call_operand.vmem [shape: f32[128,128], index: 3, kind: output, shape index: {0}]   ;;  %s551_s2 = inlined_call_operand.vmem [shape: f32[2,128], index: 2, kind: input, shape index: {}]   ;;  %s552_s4 = inlined_call_operand.vmem [shape: f32[2,128], index: 4, kind: output, shape index: {1}]  }
   0x1   :  { %v408_v0 = vld [vmem:[%s548_s1] sm:$0xff]   ;;  %v409_v1 = vld [vmem:[%s548_s1 + $0x8] sm:$0xff]   ;;  %v410_v2 = vld [vmem:[%s548_s1 + $0x10] sm:$0xff]   ;;  %21 = vst [vmem:[#allocation2] sm:$0x3] %v422_v12 }
   0x2   :  { %375 = vmatprep.subr.bf16.mxu0 %v408_v0  ;;  %399 = vmatprep.subr.bf16.mxu1 %v408_v0  ;;  %v412_v3 = vld [vmem:[%s549_s0] sm:$0xff]   ;;  %v411_v4 = vld [vmem:[%s548_s1 + $0x18] sm:$0xff]   ;;  %v413_v6 = vld [vmem:[%s549_s0 + $0x8] sm:$0xff]  }
   0x3   :  { %376 = vmatpush3.bf16.msra.mxu0 %v408_v0  ;;  %403 = vmatpush3.bf16.msra.mxu1 %v408_v0  ;;  %v416_v5 = vld [vmem:[%s549_s0 + $0x20] sm:$0xff]   ;;  %v417_v7 = vld [vmem:[%s549_s0 + $0x28] sm:$0xff]   ;;  %v414_v8 = vld [vmem:[%s549_s0 + $0x10] sm:$0xff]  }
   0x4   :  { %377 = vmatprep.subr.bf16.mxu0 %v409_v1  ;;  %400 = vmatprep.subr.bf16.mxu1 %v409_v1  ;;  %v418_v9 = vld [vmem:[%s549_s0 + $0x30] sm:$0xff]   ;;  %v415_v10 = vld [vmem:[%s549_s0 + $0x18] sm:$0xff]  }
   0x5   :  { %383 = vmatprep.mubr.msk.bf16.mxu0 %vm110_vm0, %v412_v3  ;;  %391 = vmatprep.mubr.msk.bf16.mxu1 %vm110_vm0, %v416_v5  ;;  %v419_v11 = vld [vmem:[%s549_s0 + $0x38] sm:$0xff]  }
   0x7   :  { %378 = vmatpush3.bf16.msra.mxu0 %v409_v1  ;;  %404 = vmatpush3.bf16.msra.mxu1 %v409_v1 }
   0x8   :  { %379 = vmatprep.subr.bf16.mxu0 %v410_v2  ;;  %401 = vmatprep.subr.bf16.mxu1 %v410_v2 }
   0xb   :  { %380 = vmatpush3.bf16.msra.mxu0 %v410_v2  ;;  %405 = vmatpush3.bf16.msra.mxu1 %v410_v2 }
   0xc   :  { %381 = vmatprep.subr.bf16.mxu0 %v411_v4  ;;  %402 = vmatprep.subr.bf16.mxu1 %v411_v4 }
   0xf   :  { %382 = vmatpush3.bf16.msra.mxu0 %v411_v4  ;;  %406 = vmatpush3.bf16.msra.mxu1 %v411_v4 }
  0x12   :  { %384 = vmatmul.mubr.msk.bf16.vlgmr.msra.gmra.mrb[0].mxu0 %vm110_vm0, %v413_v6  ;;  %392 = vmatmul.mubr.msk.bf16.vlgmr.msra.gmra.mrb[0].mxu1 %vm110_vm0, %v417_v7 }
  0x13   :  { %387 = vmatprep.mubr.msk.bf16.mxu0 %vm110_vm0, %v414_v8  ;;  %395 = vmatprep.mubr.msk.bf16.mxu1 %vm110_vm0, %v418_v9 }
  0x1a   :  { %388 = vmatmul.mubr.msk.bf16.gmra.mrb[4].mxu0 %vm110_vm0, %v415_v10  ;;  %396 = vmatmul.mubr.msk.bf16.gmra.mrb[4].mxu1 %vm110_vm0, %v419_v11 }
  0xe5   :  { %v385_v13 = vpop.f32.mrb[0].mxu0  ;;  %v393_v14 = vpop.f32.mrb[0].mxu1 }
  0xe6   :  { %234 = vst [vmem:[%s550_s3 + $0x10] sm:$0xff] %v385_v13  ;;  %v169_v15 = vpop.f32.mrb[1].mxu0  ;;  %242 = vst [vmem:[%s550_s3 + $0x50] sm:$0xff] %v393_v14  ;;  %v201_v16 = vpop.f32.mrb[1].mxu1  ;;  %v272_v24 = vmul.f32 %v385_v13, %v385_v13  ;;  %v280_v56 = vmul.f32 %v393_v14, %v393_v14 }
  0xe7   :  { %232 = vst [vmem:[%s550_s3] sm:$0xff] %v169_v15  ;;  %v386_v17 = vpop.f32.mrb[2].mxu0  ;;  %240 = vst [vmem:[%s550_s3 + $0x40] sm:$0xff] %v201_v16  ;;  %v394_v18 = vpop.f32.mrb[2].mxu1  ;;  %v270_v21 = vmul.f32 %v169_v15, %v169_v15  ;;  %v278_v50 = vmul.f32 %v201_v16, %v201_v16 }
  0xe8   :  { %235 = vst [vmem:[%s550_s3 + $0x18] sm:$0xff] %v386_v17  ;;  %v172_v19 = vpop.f32.mrb[3].mxu0  ;;  %243 = vst [vmem:[%s550_s3 + $0x58] sm:$0xff] %v394_v18  ;;  %v204_v20 = vpop.f32.mrb[3].mxu1  ;;  %v273_v27 = vmul.f32 %v386_v17, %v386_v17  ;;  %v281_v59 = vmul.f32 %v394_v18, %v394_v18 }
  0xe9   :  { %233 = vst [vmem:[%s550_s3 + $0x8] sm:$0xff] %v172_v19  ;;  %v249_v22 = vadd.f32 %v172_v19, %v169_v15  ;;  %v271_v23 = vmul.f32 %v172_v19, %v172_v19  ;;  %241 = vst [vmem:[%s550_s3 + $0x48] sm:$0xff] %v204_v20  ;;  %v279_v55 = vmul.f32 %v204_v20, %v204_v20 }
  0xeb   :  { %v250_v25 = vadd.f32 %v385_v13, %v249_v22  ;;  %v286_v26 = vadd.f32 %v271_v23, %v270_v21  ;;  %v248_v21 = vld [vmem:[#allocation2] sm:$0x3] }
  0xed   :  { %v287_v28 = vadd.f32 %v286_v26, %v272_v24  ;;  %v389_v29 = vpop.f32.mrb[4].mxu0  ;;  %v251_v30 = vadd.f32 %v386_v17, %v250_v25  ;;  %v397_v31 = vpop.f32.mrb[4].mxu1 }
  0xee   :  { %238 = vst [vmem:[%s550_s3 + $0x30] sm:$0xff] %v389_v29  ;;  %v185_v32 = vpop.f32.mrb[5].mxu0  ;;  %246 = vst [vmem:[%s550_s3 + $0x70] sm:$0xff] %v397_v31  ;;  %v217_v33 = vpop.f32.mrb[5].mxu1  ;;  %v276_v44 = vmul.f32 %v389_v29, %v389_v29  ;;  %v284_v4 = vmul.f32 %v397_v31, %v397_v31 }
  0xef   :  { %236 = vst [vmem:[%s550_s3 + $0x20] sm:$0xff] %v185_v32  ;;  %v252_v34 = vadd.f32 %v251_v30, %v185_v32  ;;  %v274_v35 = vmul.f32 %v185_v32, %v185_v32  ;;  %v288_v36 = vadd.f32 %v287_v28, %v273_v27  ;;  %v390_v37 = vpop.f32.mrb[6].mxu0  ;;  %244 = vst [vmem:[%s550_s3 + $0x60] sm:$0xff] %v217_v33  ;;  %v398_v38 = vpop.f32.mrb[6].mxu1 }
  0xf0   :  { %239 = vst [vmem:[%s550_s3 + $0x38] sm:$0xff] %v390_v37  ;;  %v188_v39 = vpop.f32.mrb[7].mxu0  ;;  %247 = vst [vmem:[%s550_s3 + $0x78] sm:$0xff] %v398_v38  ;;  %v220_v40 = vpop.f32.mrb[7].mxu1  ;;  %v277_v47 = vmul.f32 %v390_v37, %v390_v37  ;;  %v282_v62 = vmul.f32 %v217_v33, %v217_v33  ;;  %v285_v7 = vmul.f32 %v398_v38, %v398_v38 }
  0xf1   :  { %v289_v41 = vadd.f32 %v288_v36, %v274_v35  ;;  %237 = vst [vmem:[%s550_s3 + $0x28] sm:$0xff] %v188_v39  ;;  %v253_v42 = vadd.f32 %v252_v34, %v188_v39  ;;  %v275_v43 = vmul.f32 %v188_v39, %v188_v39  ;;  %245 = vst [vmem:[%s550_s3 + $0x68] sm:$0xff] %v220_v40 }
  0xf2   :  { %v283_v3 = vmul.f32 %v220_v40, %v220_v40 }
  0xf3   :  { %v254_v45 = vadd.f32 %v389_v29, %v253_v42  ;;  %v290_v46 = vadd.f32 %v289_v41, %v275_v43 }
  0xf5   :  { %v291_v48 = vadd.f32 %v290_v46, %v276_v44  ;;  %v255_v49 = vadd.f32 %v390_v37, %v254_v45 }
  0xf7   :  { %v256_v51 = vadd.f32 %v255_v49, %v201_v16  ;;  %v292_v52 = vadd.f32 %v291_v48, %v277_v47 }
  0xf9   :  { %v293_v53 = vadd.f32 %v292_v52, %v278_v50  ;;  %v257_v54 = vadd.f32 %v256_v51, %v204_v20 }
  0xfb   :  { %v258_v57 = vadd.f32 %v393_v14, %v257_v54  ;;  %v294_v58 = vadd.f32 %v293_v53, %v279_v55 }
  0xfd   :  { %v295_v60 = vadd.f32 %v294_v58, %v280_v56  ;;  %v259_v61 = vadd.f32 %v394_v18, %v258_v57 }
  0xff   :  { %v260_v63 = vadd.f32 %v259_v61, %v217_v33  ;;  %v296_v0 = vadd.f32 %v295_v60, %v281_v59  ;;  %v315_v33 = vld [vmem:[%s551_s2] sm:$0x3] }
 0x101   :  { %v297_v1 = vadd.f32 %v296_v0, %v282_v62  ;;  %v261_v2 = vadd.f32 %v260_v63, %v220_v40 }
 0x103   :  { %v262_v5 = vadd.f32 %v397_v31, %v261_v2  ;;  %v298_v6 = vadd.f32 %v297_v1, %v283_v3 }
 0x105   :  { %v263_v8 = vadd.f32 %v398_v38, %v262_v5  ;;  %v299_v9 = vadd.f32 %v298_v6, %v284_v4 }
 0x107   :  { %v264_v10 = vrot.slane %v263_v8, 4  ;;  %v300_v11 = vadd.f32 %v299_v9, %v285_v7 }
 0x109   :  { %v265_v12 = vadd.f32 %v264_v10, %v263_v8  ;;  %v301_v13 = vrot.slane %v300_v11, 4 }
 0x10b   :  { %v266_v14 = vrot.slane %v265_v12, 2  ;;  %v302_v15 = vadd.f32 %v301_v13, %v300_v11 }
 0x10d   :  { %v267_v16 = vadd.f32 %v266_v14, %v265_v12  ;;  %v303_v17 = vrot.slane %v302_v15, 2 }
 0x10f   :  { %v268_v18 = vrot.slane %v267_v16, 1  ;;  %v304_v19 = vadd.f32 %v303_v17, %v302_v15 }
 0x111   :  { %v305_v20 = vrot.slane %v304_v19, 1  ;;  %v269_v22 = vadd.f32 %v268_v18, %v267_v16 }
 0x113   :  { %v306_v23 = vadd.f32 %v305_v20, %v304_v19 }
 0x115   :  { %v308_v24 = vsel %vm307_vm1, %v269_v22, %v306_v23 }
 0x116   :  { %v309_v25 = vadd.f32 %v308_v24, %v248_v21 }
 0x118   :  { %310 = vst [vmem:[#allocation2] sm:$0x3] %v309_v25 }
 0x11f   :  { %v314_v26 = vld [vmem:[#allocation2] sm:$0x3] }
 0x120   :  { %v316_v27 = vmul.f32 0.0078125, %v314_v26 }
 0x122   :  { %v317_v28 = vmul.f32 %v316_v27, %v316_v27 }
 0x124   :  { %v319_v29 = vrot.slane %v317_v28, 7 }
 0x126   :  { %v321_v30 = vsub.f32 %v316_v27, %v319_v29 }
 0x128   :  { %v322_v31 = vadd.f32 1e-05, %v321_v30 }
 0x12a   :  { %420 = vrsqrt.f32 %v322_v31 }
 0x134   :  { %v421_v32 = vpop.eup %420 }
 0x135   :  { %v325_v34 = vrot.slane %v421_v32, 1 }
 0x137   :  { %v327_v35 = vmul.f32 %v325_v34, %v315_v33 }
 0x139   :  { %v328_v36 = vmul.f32 %v327_v35, %v316_v27 }
 0x13b   :  { %v330_v37 = vrot.slane %v328_v36, 7 }
 0x13d   :  { %v332_v38 = vsub.f32 %v315_v33, %v330_v37 }
 0x13f   :  { %v333_v39 = vsel %vm307_vm1, %v327_v35, %v332_v38 }
 0x140   :  { %334 = vst [vmem:[%s552_s4] sm:$0x3] %v333_v39 }

</bundles_post_ra>
